<compile_context>
chip_gen: v7x
topology: tpu7x:2x2x1
jax: 0.10.0
libtpu: 0.0.40
codegen_flags: <defaults>
</compile_context>

<pallas_src>
import functools

import jax
import jax.numpy as jnp
from jax.experimental import pallas as pl
from jax.experimental.pallas import tpu as pltpu

_H1_PAD = 256            # 250 -> 256 (lane aligned)
_H2_PAD = 128            # 100 -> 128
_LANE = 128
_TARGET_TB = 2048        # batch-tile target (amortizes per-grid-step overhead)
_VMEM_LIMIT = 48 * 1024 * 1024


def _round_up(n, m):
    return ((n + m - 1) // m) * m


def _mlp_softmax_kernel(x_ref, w1_ref, b1_ref, w2_ref, b2_ref, w3_ref, b3_ref,
                        o_ref, *, out_dim):
    """One batch tile: 3x (Linear + ReLU) then softmax over classes.

    Matmuls: bf16 operands, f32 MXU accumulation. Bias/ReLU/softmax in f32.
    Padded hidden/output columns are exactly zero through the ReLU chain;
    padded class lanes are zeroed in `e` before the softmax sum (exact).
    """
    x = x_ref[...].astype(jnp.bfloat16)                 # in-kernel cast (4 B/elem HBM read)

    # Layer 1: Linear(input_dim -> 250 padded to 256) + ReLU
    h1 = jnp.dot(x, w1_ref[...], preferred_element_type=jnp.float32) + b1_ref[...]
    h1 = jnp.maximum(h1, 0.0)

    # Layer 2: Linear(256 -> 100 padded to 128) + ReLU
    h2 = jnp.dot(h1.astype(jnp.bfloat16), w2_ref[...],
                 preferred_element_type=jnp.float32) + b2_ref[...]
    h2 = jnp.maximum(h2, 0.0)

    # Layer 3: Linear(128 -> out_dim padded to multiple of 128) + ReLU
    y = jnp.dot(h2.astype(jnp.bfloat16), w3_ref[...],
                preferred_element_type=jnp.float32) + b3_ref[...]
    y = jnp.maximum(y, 0.0)                             # padded class lanes are exactly 0

    # Numerically-stable softmax. All y >= 0 after ReLU, so the row max over
    # the padded slab equals the max over real classes.
    m = jnp.max(y, axis=-1, keepdims=True)
    e = jnp.exp(y - m)
    out_pad = y.shape[-1]
    if out_dim != out_pad:
        lane = jax.lax.broadcasted_iota(jnp.int32, (1, out_pad), 1)
        e = jnp.where(lane < out_dim, e, 0.0)           # zero padded-class contributions
    denom = jnp.sum(e, axis=-1, keepdims=True)
    o_ref[...] = (e / denom).astype(o_ref.dtype)        # exact divide: rows sum to 1


def prepare_params(params):
    """Pad weights/biases to lane-aligned shapes; cast weights to bf16.

    w1 keeps its true K (= input_dim) rows so x needs no feature padding.
    Zero-padded columns/rows are exact through the ReLU layers.
    """
    w1, b1, w2, b2, w3, b3 = params
    out_dim = w3.shape[1]
    out_pad = _round_up(out_dim, _LANE)

    def pad_to(a, shape):
        return jnp.pad(a, [(0, t - s) for s, t in zip(a.shape, shape)])

    w1p = pad_to(w1, (w1.shape[0], _H1_PAD)).astype(jnp.bfloat16)
    w2p = pad_to(w2, (_H1_PAD, _H2_PAD)).astype(jnp.bfloat16)
    w3p = pad_to(w3, (_H2_PAD, out_pad)).astype(jnp.bfloat16)
    b1p = pad_to(b1.reshape(1, -1), (1, _H1_PAD)).astype(jnp.float32)
    b2p = pad_to(b2.reshape(1, -1), (1, _H2_PAD)).astype(jnp.float32)
    b3p = pad_to(b3.reshape(1, -1), (1, out_pad)).astype(jnp.float32)
    return (w1p, b1p, w2p, b2p, w3p, b3p), out_dim


def _choose_tile(batch, din, out_pad):
    """Adaptive batch tile: amortize grid overhead, respect VMEM, feed megacore."""
    # VMEM bytes per batch row: x (f32, double-buffered) + out (f32, double-
    # buffered) + f32 temporaries (h1, h2, y/e).
    bytes_per_row = (2 * din * 4 + 2 * out_pad * 4
                     + (_H1_PAD + _H2_PAD + 2 * out_pad) * 4)
    cap = max(8, (24 * 1024 * 1024) // bytes_per_row)
    target = min(_TARGET_TB, cap)
    # Note: for very large input_dim (din_pad beyond ~8-16K) a K grid axis
    # ("arbitrary") with a VMEM accumulator would be needed; not required here.

    if batch < 32:
        return batch, 1                                  # single full-extent block
    n_tiles = max(2, pl.cdiv(batch, target))             # >=2 tiles -> v7x megacore split
    tb = _round_up(pl.cdiv(batch, n_tiles), 8)           # f32 sublane alignment
    n_tiles = pl.cdiv(batch, tb)                         # last block may be partial (masked)
    return tb, n_tiles


@functools.partial(jax.jit, static_argnums=(2,))
def perceptron_forward(x, prepared_params, out_dim):
    """x: [B, C, H, W] (NCHW, like PyTorch). Returns softmax probs [B, out_dim]."""
    w1, b1, w2, b2, w3, b3 = prepared_params
    din = w1.shape[0]
    out_pad = w3.shape[1]

    batch = x.shape[0]
    x2d = x.reshape(batch, -1)                           # layout-only; stays f32, no extra pass
    assert x2d.shape[1] == din, "flattened input_dim must match w1 rows"

    tb, n_tiles = _choose_tile(batch, din, out_pad)

    flops = 2 * batch * (din * _H1_PAD + _H1_PAD * _H2_PAD + _H2_PAD * out_pad)
    bytes_accessed = (x2d.size * x2d.dtype.itemsize
                      + (w1.size + w2.size + w3.size) * 2
                      + (b1.size + b2.size + b3.size) * 4
                      + batch * out_pad * 4)

    kernel = functools.partial(_mlp_softmax_kernel, out_dim=out_dim)

    out = pl.pallas_call(
        kernel,
        out_shape=jax.ShapeDtypeStruct((batch, out_pad), jnp.float32),
        grid=(n_tiles,),
        in_specs=[
            pl.BlockSpec((tb, din), lambda i: (i, 0)),         # x tile (pipelined)
            pl.BlockSpec((din, _H1_PAD), lambda i: (0, 0)),    # resident weights/biases
            pl.BlockSpec((1, _H1_PAD), lambda i: (0, 0)),
            pl.BlockSpec((_H1_PAD, _H2_PAD), lambda i: (0, 0)),
            pl.BlockSpec((1, _H2_PAD), lambda i: (0, 0)),
            pl.BlockSpec((_H2_PAD, out_pad), lambda i: (0, 0)),
            pl.BlockSpec((1, out_pad), lambda i: (0, 0)),
        ],
        out_specs=pl.BlockSpec((tb, out_pad), lambda i: (i, 0)),
        compiler_params=pltpu.CompilerParams(
            dimension_semantics=("parallel",),
            vmem_limit_bytes=_VMEM_LIMIT),
        cost_estimate=pl.CostEstimate(
            flops=flops,
            transcendentals=batch * out_pad,
            bytes_accessed=bytes_accessed),
    )(x2d, w1, b1, w2, b2, w3, b3)

    if out_dim != out_pad:
        out = out[:, :out_dim]
    return out


def init_params(key, input_dim, output_dim):
    """Init matching the PyTorch module's parameter shapes (weights stored [in, out])."""
    dims = [(input_dim, 250), (250, 100), (100, output_dim)]
    params = []
    for i, (fan_in, fan_out) in enumerate(dims):
        kw, kb = jax.random.split(jax.random.fold_in(key, i))
        bound = 1.0 / jnp.sqrt(fan_in)                  # nn.Linear default init scheme
        w = jax.random.uniform(kw, (fan_in, fan_out), jnp.float32, -bound, bound)
        b = jax.random.uniform(kb, (fan_out,), jnp.float32, -bound, bound)
        params += [w, b]
    return tuple(params)


def _reference(x, params):
    """Pure-JAX reference mirroring the kernel's bf16-matmul / f32-epilogue numerics."""
    w1, b1, w2, b2, w3, b3 = params
    h = x.reshape(x.shape[0], -1).astype(jnp.bfloat16)
    h = jnp.maximum(jnp.dot(h, w1.astype(jnp.bfloat16),
                            preferred_element_type=jnp.float32) + b1, 0.0)
    h = jnp.maximum(jnp.dot(h.astype(jnp.bfloat16), w2.astype(jnp.bfloat16),
                            preferred_element_type=jnp.float32) + b2, 0.0)
    y = jnp.maximum(jnp.dot(h.astype(jnp.bfloat16), w3.astype(jnp.bfloat16),
                            preferred_element_type=jnp.float32) + b3, 0.0)
    return jax.nn.softmax(y, axis=-1)


if __name__ == "__main__":
    key = jax.random.PRNGKey(0)
    k_x, k_p = jax.random.split(key)

    # Small NCHW input, consistent with x.view(batch, -1) in the module.
    B, C, H, W = 2, 4, 8, 8
    input_dim = C * H * W          # 256
    output_dim = 10

    x = jax.random.normal(k_x, (B, C, H, W), jnp.float32)
    params = init_params(k_p, input_dim, output_dim)
    prepared, out_dim = prepare_params(params)

    out = perceptron_forward(x, prepared, out_dim)
    out = jax.block_until_ready(out)

    ref = _reference(x, params)
    assert out.shape == (B, output_dim)
    assert jnp.allclose(out, ref, atol=2e-3, rtol=2e-2), "mismatch vs JAX reference"
    assert jnp.allclose(out.sum(-1), 1.0, atol=1e-3), "rows must sum to 1"

    print("KERNEL_OK")
</pallas_src>

<mosaic_0001>
module attributes {stable_mosaic.version = 11 : i64} {
  func.func @_mlp_softmax_kernel(%arg0: i32, %arg1: memref<2x256xf32, #tpu.memory_space<vmem>>, %arg2: memref<256x256xbf16, #tpu.memory_space<vmem>>, %arg3: memref<1x256xf32, #tpu.memory_space<vmem>>, %arg4: memref<256x128xbf16, #tpu.memory_space<vmem>>, %arg5: memref<1x128xf32, #tpu.memory_space<vmem>>, %arg6: memref<128x128xbf16, #tpu.memory_space<vmem>>, %arg7: memref<1x128xf32, #tpu.memory_space<vmem>>, %arg8: memref<2x128xf32, #tpu.memory_space<vmem>>) attributes {dimension_semantics = [#tpu.dimension_semantics<parallel>], iteration_bounds = array<i64: 1>, scalar_prefetch = 0 : i64, scratch_operands = 0 : i64, tpu.core_type = #tpu.core_type<tc>, window_params = [{transform_indices = @transform_0, window_bounds = array<i64: 2, 256>}, {pipeline_mode = #tpu.pipeline_mode<synchronous>, transform_indices = @transform_1, window_bounds = array<i64: 256, 256>}, {pipeline_mode = #tpu.pipeline_mode<synchronous>, transform_indices = @transform_2, window_bounds = array<i64: 1, 256>}, {pipeline_mode = #tpu.pipeline_mode<synchronous>, transform_indices = @transform_3, window_bounds = array<i64: 256, 128>}, {pipeline_mode = #tpu.pipeline_mode<synchronous>, transform_indices = @transform_4, window_bounds = array<i64: 1, 128>}, {pipeline_mode = #tpu.pipeline_mode<synchronous>, transform_indices = @transform_5, window_bounds = array<i64: 128, 128>}, {pipeline_mode = #tpu.pipeline_mode<synchronous>, transform_indices = @transform_6, window_bounds = array<i64: 1, 128>}, {transform_indices = @transform_7, window_bounds = array<i64: 2, 128>}]} {
    %c0 = arith.constant 0 : index
    %c0_0 = arith.constant 0 : index
    %0 = vector.load %arg1[%c0, %c0_0] : memref<2x256xf32, #tpu.memory_space<vmem>>, vector<2x256xf32>
    %1 = arith.truncf %0 : vector<2x256xf32> to vector<2x256xbf16>
    %c0_1 = arith.constant 0 : index
    %c0_2 = arith.constant 0 : index
    %2 = vector.load %arg2[%c0_1, %c0_2] : memref<256x256xbf16, #tpu.memory_space<vmem>>, vector<256x256xbf16>
    %cst = arith.constant dense<0.000000e+00> : vector<2x256xf32>
    %3 = tpu.matmul %1, %2, %cst {dimension_numbers = #tpu.dot_dimension_numbers<[1], [0], [0], [1], [0, 0, 1, 1], [], []>} : vector<2x256xbf16>, vector<256x256xbf16>, vector<2x256xf32> -> vector<2x256xf32>
    %c0_3 = arith.constant 0 : index
    %c0_4 = arith.constant 0 : index
    %4 = vector.load %arg3[%c0_3, %c0_4] : memref<1x256xf32, #tpu.memory_space<vmem>>, vector<1x256xf32>
    %5 = vector.broadcast %4 : vector<1x256xf32> to vector<2x256xf32>
    %6 = arith.addf %3, %5 : vector<2x256xf32>
    %cst_5 = arith.constant 0.000000e+00 : f32
    %7 = vector.broadcast %cst_5 : f32 to vector<2x256xf32>
    %8 = arith.maximumf %6, %7 : vector<2x256xf32>
    %9 = arith.truncf %8 : vector<2x256xf32> to vector<2x256xbf16>
    %c0_6 = arith.constant 0 : index
    %c0_7 = arith.constant 0 : index
    %10 = vector.load %arg4[%c0_6, %c0_7] : memref<256x128xbf16, #tpu.memory_space<vmem>>, vector<256x128xbf16>
    %cst_8 = arith.constant dense<0.000000e+00> : vector<2x128xf32>
    %11 = tpu.matmul %9, %10, %cst_8 {dimension_numbers = #tpu.dot_dimension_numbers<[1], [0], [0], [1], [0, 0, 1, 1], [], []>} : vector<2x256xbf16>, vector<256x128xbf16>, vector<2x128xf32> -> vector<2x128xf32>
    %c0_9 = arith.constant 0 : index
    %c0_10 = arith.constant 0 : index
    %12 = vector.load %arg5[%c0_9, %c0_10] : memref<1x128xf32, #tpu.memory_space<vmem>>, vector<1x128xf32>
    %13 = vector.broadcast %12 : vector<1x128xf32> to vector<2x128xf32>
    %14 = arith.addf %11, %13 : vector<2x128xf32>
    %cst_11 = arith.constant 0.000000e+00 : f32
    %15 = vector.broadcast %cst_11 : f32 to vector<2x128xf32>
    %16 = arith.maximumf %14, %15 : vector<2x128xf32>
    %17 = arith.truncf %16 : vector<2x128xf32> to vector<2x128xbf16>
    %c0_12 = arith.constant 0 : index
    %c0_13 = arith.constant 0 : index
    %18 = vector.load %arg6[%c0_12, %c0_13] : memref<128x128xbf16, #tpu.memory_space<vmem>>, vector<128x128xbf16>
    %cst_14 = arith.constant dense<0.000000e+00> : vector<2x128xf32>
    %19 = tpu.matmul %17, %18, %cst_14 {dimension_numbers = #tpu.dot_dimension_numbers<[1], [0], [0], [1], [0, 0, 1, 1], [], []>} : vector<2x128xbf16>, vector<128x128xbf16>, vector<2x128xf32> -> vector<2x128xf32>
    %c0_15 = arith.constant 0 : index
    %c0_16 = arith.constant 0 : index
    %20 = vector.load %arg7[%c0_15, %c0_16] : memref<1x128xf32, #tpu.memory_space<vmem>>, vector<1x128xf32>
    %21 = vector.broadcast %20 : vector<1x128xf32> to vector<2x128xf32>
    %22 = arith.addf %19, %21 : vector<2x128xf32>
    %cst_17 = arith.constant 0.000000e+00 : f32
    %23 = vector.broadcast %cst_17 : f32 to vector<2x128xf32>
    %24 = arith.maximumf %22, %23 : vector<2x128xf32>
    %cst_18 = arith.constant dense<0xFF800000> : vector<2xf32>
    %25 = vector.multi_reduction <maximumf>, %24, %cst_18 [1] : vector<2x128xf32> to vector<2xf32>
    %26 = vector.shape_cast %25 : vector<2xf32> to vector<2x1xf32>
    %27 = vector.broadcast %26 : vector<2x1xf32> to vector<2x128xf32>
    %28 = arith.subf %24, %27 : vector<2x128xf32>
    %29 = math.exp %28 : vector<2x128xf32>
    %30 = tpu.iota {dimensions = array<i32: 1>} : vector<1x128xi32>
    %c10_i32 = arith.constant 10 : i32
    %31 = vector.broadcast %c10_i32 : i32 to vector<1x128xi32>
    %32 = arith.cmpi slt, %30, %31 : vector<1x128xi32>
    %cst_19 = arith.constant 0.000000e+00 : f32
    %33 = vector.shape_cast %32 : vector<1x128xi1> to vector<1x128xi1>
    %34 = vector.broadcast %33 : vector<1x128xi1> to vector<2x128xi1>
    %35 = vector.broadcast %cst_19 : f32 to vector<2x128xf32>
    %36 = arith.select %34, %29, %35 : vector<2x128xi1>, vector<2x128xf32>
    %cst_20 = arith.constant dense<0.000000e+00> : vector<2xf32>
    %37 = vector.multi_reduction <add>, %36, %cst_20 [1] : vector<2x128xf32> to vector<2xf32>
    %38 = vector.shape_cast %37 : vector<2xf32> to vector<2x1xf32>
    %39 = vector.broadcast %38 : vector<2x1xf32> to vector<2x128xf32>
    %40 = arith.divf %36, %39 : vector<2x128xf32>
    %c0_21 = arith.constant 0 : index
    %c0_22 = arith.constant 0 : index
    %41 = vector.load %arg8[%c0_21, %c0_22] : memref<2x128xf32, #tpu.memory_space<vmem>>, vector<2x128xf32>
    tpu.vector_store %arg8[%c0_21, %c0_22], %40 {strides = array<i32>} : memref<2x128xf32, #tpu.memory_space<vmem>>, vector<2x128xf32>,
    return
  }
  func.func @transform_0(%arg0: i32) -> (i32, i32) {
    %c0_i32 = arith.constant 0 : i32
    %c0_i32_0 = arith.constant 0 : i32
    return %arg0, %c0_i32 : i32, i32
  }
  func.func @transform_1(%arg0: i32) -> (i32, i32) {
    %c0_i32 = arith.constant 0 : i32
    %c0_i32_0 = arith.constant 0 : i32
    %c0_i32_1 = arith.constant 0 : i32
    return %c0_i32, %c0_i32_0 : i32, i32
  }
  func.func @transform_2(%arg0: i32) -> (i32, i32) {
    %c0_i32 = arith.constant 0 : i32
    %c0_i32_0 = arith.constant 0 : i32
    %c0_i32_1 = arith.constant 0 : i32
    return %c0_i32, %c0_i32_0 : i32, i32
  }
  func.func @transform_3(%arg0: i32) -> (i32, i32) {
    %c0_i32 = arith.constant 0 : i32
    %c0_i32_0 = arith.constant 0 : i32
    %c0_i32_1 = arith.constant 0 : i32
    return %c0_i32, %c0_i32_0 : i32, i32
  }
  func.func @transform_4(%arg0: i32) -> (i32, i32) {
    %c0_i32 = arith.constant 0 : i32
    %c0_i32_0 = arith.constant 0 : i32
    %c0_i32_1 = arith.constant 0 : i32
    return %c0_i32, %c0_i32_0 : i32, i32
  }
  func.func @transform_5(%arg0: i32) -> (i32, i32) {
    %c0_i32 = arith.constant 0 : i32
    %c0_i32_0 = arith.constant 0 : i32
    %c0_i32_1 = arith.constant 0 : i32
    return %c0_i32, %c0_i32_0 : i32, i32
  }
  func.func @transform_6(%arg0: i32) -> (i32, i32) {
    %c0_i32 = arith.constant 0 : i32
    %c0_i32_0 = arith.constant 0 : i32
    %c0_i32_1 = arith.constant 0 : i32
    return %c0_i32, %c0_i32_0 : i32, i32
  }
  func.func @transform_7(%arg0: i32) -> (i32, i32) {
    %c0_i32 = arith.constant 0 : i32
    %c0_i32_0 = arith.constant 0 : i32
    return %arg0, %c0_i32 : i32, i32
  }
}

</mosaic_0001>

<bundles_post_ra>
// kernel: perceptron_forward.1
= control target key start
LH: loop header
LB: loop body
LE: loop exit
PB: predicated region body
PF: predicated region fallthrough
CT: control target
= control target key end

     0   :  { %12 = vsyncpa [#allocation3], 0  ;;  %s1039_s0 = inlined_call_operand.vmem [shape: f32[2,256], index: 0, kind: input, shape index: {}]   ;;  %s1040_s1 = inlined_call_operand.hbm [shape: bf16[256,256], index: 1, kind: input, shape index: {}]   ;;  %s1041_s2 = inlined_call_operand.vmem [shape: f32[1,256], index: 2, kind: input, shape index: {}]   ;;  %s1042_s3 = inlined_call_operand.hbm [shape: bf16[256,128], index: 3, kind: input, shape index: {}]   ;;  %s1043_s4 = inlined_call_operand.vmem [shape: f32[1,128], index: 4, kind: input, shape index: {}]   ;;  %s1044_s5 = inlined_call_operand.vmem [shape: bf16[128,128], index: 5, kind: input, shape index: {}]   ;;  %s1045_s6 = inlined_call_operand.vmem [shape: f32[1,128], index: 6, kind: input, shape index: {}]   ;;  %s1046_s7 = inlined_call_operand.hbm [shape: f32[2,128], index: 7, kind: output, shape index: {}]  }
   0x1   :  { %13 = vsyncpa [#allocation6], 0 }
   0x2   :  { %14 = vsyncpa [#allocation4], 0  ;;  %s910_s24 = smov [#allocation2]   ;;  %s838_s28 = scalar_lea.hbm %s1040_s1, 4096 }
   0x3   :  { %s22_s25 = sshll.u32 %s910_s24, 4  ;;  %p839_p0 = scmp.ne.s32.totalorder %s1040_s1, %s838_s28  ;;  %s23_s25 = int_to_ptr.vmem [resolvable:$true] %s22_s25 }
   0x4   :  { %p842_p1 = scmp.lt.u32.totalorder %s838_s28, %s1040_s1 }
   0x6   :  { %p844_p2 = pnand %p842_p1, %p839_p0 }
   0x8   :  { %847 = shalt.err (!%p844_p2)
}
   0x9   :  { %s848_s10 = scalar_lea.vmem %s23_s25, 4096  ;;  %p853_p4 = scmp.lt.s32.totalorder %s23_s25, %s23_s25 }
   0xa   :  { %p849_p3 = scmp.ne.s32.totalorder %s23_s25, %s848_s10  ;;  %p854_p5 = scmp.lt.s32.totalorder %s848_s10, %s848_s10 }
   0xc   :  { %p855_p6 = por %p854_p5, %p853_p4 }
   0xe   :  { %p856_p7 = pnand %p855_p6, %p849_p3 }
  0x10   :  { %859 = shalt.err (!%p856_p7)
}
  0x11   :  { %s911_s11 = smov 128   ;;  %s912_s12 = smov 8  }
  0x12   :  { %28 = dma.hbm_to_vmem [thread:$0]  %s1040_s1, 4096, %s23_s25, [#allocation3], %s911_s11, %s911_s11, %s912_s12  }
  0x13   :  { %s913_s15 = smov [#allocation5]   ;;  %s860_s19 = scalar_lea.hbm %s1042_s3, 2048 }
  0x14   :  { %s36_s16 = sshll.u32 %s913_s15, 4  ;;  %p861_p8 = scmp.ne.s32.totalorder %s1042_s3, %s860_s19  ;;  %s37_s16 = int_to_ptr.vmem [resolvable:$true] %s36_s16 }
  0x15   :  { %p864_p9 = scmp.lt.u32.totalorder %s860_s19, %s1042_s3 }
  0x17   :  { %p866_p10 = pnand %p864_p9, %p861_p8 }
  0x19   :  { %869 = shalt.err (!%p866_p10)
}
  0x1a   :  { %s870_s24 = scalar_lea.vmem %s37_s16, 2048  ;;  %p875_p12 = scmp.lt.s32.totalorder %s37_s16, %s37_s16 }
  0x1b   :  { %p871_p11 = scmp.ne.s32.totalorder %s37_s16, %s870_s24  ;;  %p876_p13 = scmp.lt.s32.totalorder %s870_s24, %s870_s24 }
  0x1d   :  { %p877_p0 = por %p876_p13, %p875_p12 }
  0x1f   :  { %p878_p1 = pnand %p877_p0, %p871_p11 }
  0x21   :  { %881 = shalt.err (!%p878_p1)
}
  0x22   :  { %s914_s1 = smov 64   ;;  %s915_s25 = smov 4  }
  0x23   :  { %42 = dma.hbm_to_vmem [thread:$0]  %s1042_s3, 2048, %s37_s16, [#allocation6], %s914_s1, %s914_s1, %s915_s25  }
  0x24   :  { %904 = dma.done.wait [#allocation3], 4096  }
  0x25   :  { %905 = vsyncadd [#allocation3], 4294963200 }
  0x26   :  { %906 = dma.done.wait [#allocation6], 2048  }
  0x27   :  { %907 = vsyncadd [#allocation6], 4294965248  ;;  %v762_v0 = vld [vmem:[#allocation2 + $0x4] ss:$8 sps:$4 sm:$0xff]   ;;  %v764_v1 = vld [vmem:[#allocation2] ss:$8 sps:$4 sm:$0xff]   ;;  %v104_v53 = vlaneseq }
  0x28   :  { %274 = vmatprep.subr.bf16.mxu0 %v762_v0  ;;  %v765_v2 = vld [vmem:[#allocation2 + $0x14] ss:$8 sps:$4 sm:$0xff]   ;;  %v767_v3 = vld [vmem:[#allocation2 + $0x10] ss:$8 sps:$4 sm:$0xff]   ;;  %v768_v4 = vld [vmem:[#allocation2 + $0x24] ss:$8 sps:$4 sm:$0xff]  }
  0x29   :  { %275 = vmatpush1.bf16.msra.mxu0 %v764_v1  ;;  %v770_v5 = vld [vmem:[#allocation2 + $0x20] ss:$8 sps:$4 sm:$0xff]   ;;  %v771_v6 = vld [vmem:[#allocation2 + $0x34] ss:$8 sps:$4 sm:$0xff]   ;;  %v773_v7 = vld [vmem:[#allocation2 + $0x30] ss:$8 sps:$4 sm:$0xff]  }
  0x2a   :  { %276 = vmatprep.subr.bf16.mxu0 %v765_v2  ;;  %v774_v8 = vld [vmem:[#allocation2 + $0x44] ss:$8 sps:$4 sm:$0xff]   ;;  %v776_v9 = vld [vmem:[#allocation2 + $0x40] ss:$8 sps:$4 sm:$0xff]   ;;  %v777_v10 = vld [vmem:[#allocation2 + $0x54] ss:$8 sps:$4 sm:$0xff]  }
  0x2b   :  { %v779_v11 = vld [vmem:[#allocation2 + $0x50] ss:$8 sps:$4 sm:$0xff]   ;;  %v780_v12 = vld [vmem:[#allocation2 + $0x64] ss:$8 sps:$4 sm:$0xff]   ;;  %v782_v13 = vld [vmem:[#allocation2 + $0x60] ss:$8 sps:$4 sm:$0xff]  }
  0x2c   :  { %v986_v14 = vld.sshfl [vmem:[%s1039_s0] sm:$0x33 pattern:$0x76325410]  ;;  %v783_v15 = vld [vmem:[#allocation2 + $0x74] ss:$8 sps:$4 sm:$0xff]  }
  0x2d   :  { %277 = vmatpush1.bf16.msra.mxu0 %v767_v3  ;;  %v65_v16 = vcombine.high %v986_v14, %v986_v14  ;;  %v810_v17 = vld [vmem:[#allocation5 + $0x40] sm:$0xff]   ;;  %v812_v20 = vld [vmem:[#allocation5 + $0x48] sm:$0xff]   ;;  %v814_v22 = vld [vmem:[#allocation5 + $0x50] sm:$0xff]   ;;  %v68_v47 = vpack.c.bf16 %v986_v14, %v986_v14  ;;  %v916_v52 = vmov 0.0   ;;  %v105_v54 = vshrl.u32 %v104_v53, 7 }
  0x2e   :  { %278 = vmatprep.subr.bf16.mxu0 %v768_v4  ;;  %v811_v18 = vld [vmem:[#allocation5] sm:$0xff]   ;;  %702 = vmatprep.subr.bf16.mxu1 %v810_v17  ;;  %v813_v21 = vld [vmem:[#allocation5 + $0x8] sm:$0xff]   ;;  %v785_v23 = vld [vmem:[#allocation2 + $0x70] ss:$8 sps:$4 sm:$0xff]   ;;  %vm917_vm0 = vmmov 0   ;;  %vm608_vm1 = vcmask 1041408  }
  0x2f   :  { %v69_v19 = vpack.c.bf16 %v65_v16, %v65_v16  ;;  %703 = vmatpush3.bf16.msra.mxu1 %v811_v18  ;;  %v786_v24 = vld [vmem:[#allocation2 + $0x84] ss:$8 sps:$4 sm:$0xff]   ;;  %v815_v25 = vld [vmem:[#allocation5 + $0x10] sm:$0xff]   ;;  %v816_v26 = vld [vmem:[#allocation5 + $0x58] sm:$0xff]   ;;  %v106_v55 = vsub.s32 0, %v105_v54  ;;  %v110_v57 = vsub.s32 1, %v105_v54 }
  0x30   :  { %704 = vmatprep.subr.bf16.mxu1 %v812_v20  ;;  %v788_v27 = vld [vmem:[#allocation2 + $0x80] ss:$8 sps:$4 sm:$0xff]   ;;  %v789_v28 = vld [vmem:[#allocation2 + $0x94] ss:$8 sps:$4 sm:$0xff]   ;;  %v791_v29 = vld [vmem:[#allocation2 + $0x90] ss:$8 sps:$4 sm:$0xff]  }
  0x31   :  { %279 = vmatpush1.bf16.msra.mxu0 %v770_v5  ;;  %306 = vmatprep.mubr.bf16.mxu0 %v69_v19  ;;  %v817_v30 = vld [vmem:[#allocation5 + $0x18] sm:$0xff]   ;;  %v792_v31 = vld [vmem:[#allocation2 + $0xa4] ss:$8 sps:$4 sm:$0xff]   ;;  %v794_v35 = vld [vmem:[#allocation2 + $0xa0] ss:$8 sps:$4 sm:$0xff]  }
  0x32   :  { %280 = vmatprep.subr.bf16.mxu0 %v771_v6  ;;  %v818_v32 = vld [vmem:[#allocation5 + $0x60] sm:$0xff]   ;;  %v820_v34 = vld [vmem:[#allocation5 + $0x68] sm:$0xff]   ;;  %v795_v36 = vld [vmem:[#allocation2 + $0xb4] ss:$8 sps:$4 sm:$0xff]  }
  0x33   :  { %705 = vmatpush3.bf16.msra.mxu1 %v813_v21  ;;  %v819_v33 = vld [vmem:[#allocation5 + $0x20] sm:$0xff]   ;;  %v821_v37 = vld [vmem:[#allocation5 + $0x28] sm:$0xff]   ;;  %v797_v38 = vld [vmem:[#allocation2 + $0xb0] ss:$8 sps:$4 sm:$0xff]  }
  0x34   :  { %706 = vmatprep.subr.bf16.mxu1 %v814_v22  ;;  %v798_v39 = vld [vmem:[#allocation2 + $0xc4] ss:$8 sps:$4 sm:$0xff]   ;;  %v800_v40 = vld [vmem:[#allocation2 + $0xc0] ss:$8 sps:$4 sm:$0xff]   ;;  %v801_v41 = vld [vmem:[#allocation2 + $0xd4] ss:$8 sps:$4 sm:$0xff]  }
  0x35   :  { %281 = vmatpush1.bf16.msra.mxu0 %v773_v7  ;;  %v803_v42 = vld [vmem:[#allocation2 + $0xd0] ss:$8 sps:$4 sm:$0xff]   ;;  %v804_v43 = vld [vmem:[#allocation2 + $0xe4] ss:$8 sps:$4 sm:$0xff]   ;;  %v806_v44 = vld [vmem:[#allocation2 + $0xe0] ss:$8 sps:$4 sm:$0xff]  }
  0x36   :  { %282 = vmatprep.subr.bf16.mxu0 %v774_v8  ;;  %v807_v45 = vld [vmem:[#allocation2 + $0xf4] ss:$8 sps:$4 sm:$0xff]   ;;  %v809_v46 = vld [vmem:[#allocation2 + $0xf0] ss:$8 sps:$4 sm:$0xff]   ;;  %v102_v56 = vld [vmem:[%s1041_s2] sm:$0x3] }
  0x37   :  { %707 = vmatpush3.bf16.msra.mxu1 %v815_v25  ;;  %v822_v48 = vld [vmem:[#allocation5 + $0x70] sm:$0xff]   ;;  %v824_v50 = vld [vmem:[#allocation5 + $0x78] sm:$0xff]   ;;  %v107_v58 = vrot.slane %v102_v56, %v106_v55  ;;  %v111_v59 = vrot.slane %v102_v56, %v110_v57  ;;  %v826_v5 = vld [vmem:[%s1044_s5] sm:$0xff]  }
  0x38   :  { %708 = vmatprep.subr.bf16.mxu1 %v816_v26  ;;  %v823_v49 = vld [vmem:[#allocation5 + $0x30] sm:$0xff]   ;;  %v825_v51 = vld [vmem:[#allocation5 + $0x38] sm:$0xff]   ;;  %v827_v7 = vld [vmem:[%s1044_s5 + $0x8] sm:$0xff]  }
  0x39   :  { %283 = vmatpush1.bf16.msra.mxu0 %v776_v9  ;;  %v828_v8 = vld [vmem:[%s1044_s5 + $0x10] sm:$0xff]   ;;  %v829_v9 = vld [vmem:[%s1044_s5 + $0x18] sm:$0xff]  }
  0x3a   :  { %284 = vmatprep.subr.bf16.mxu0 %v777_v10  ;;  %v830_v10 = vld [vmem:[%s1044_s5 + $0x20] sm:$0xff]  }
  0x3b   :  { %709 = vmatpush3.bf16.msra.mxu1 %v817_v30 }
  0x3c   :  { %710 = vmatprep.subr.bf16.mxu1 %v818_v32 }
  0x3d   :  { %285 = vmatpush1.bf16.msra.mxu0 %v779_v11  ;;  %v831_v11 = vld [vmem:[%s1044_s5 + $0x28] sm:$0xff]  }
  0x3e   :  { %286 = vmatprep.subr.bf16.mxu0 %v780_v12  ;;  %v832_v12 = vld [vmem:[%s1044_s5 + $0x30] sm:$0xff]  }
  0x3f   :  { %711 = vmatpush3.bf16.msra.mxu1 %v819_v33 }
  0x40   :  { %712 = vmatprep.subr.bf16.mxu1 %v820_v34  ;;  %v616_v34 = vand.u32 127, %v104_v53 }
  0x41   :  { %287 = vmatpush1.bf16.msra.mxu0 %v782_v13  ;;  %v833_v13 = vld [vmem:[%s1044_s5 + $0x38] sm:$0xff]  }
  0x42   :  { %288 = vmatprep.subr.bf16.mxu0 %v783_v15  ;;  %v676_v15 = vld [vmem:[%s1043_s4] ss:$0 sm:$0xff]  ;;  %vm617_vm2 = vcmp.lt.s32.totalorder %v616_v34, 10  ;;  %s918_s4 = smov [#allocation7]  }
  0x43   :  { %713 = vmatpush3.bf16.msra.mxu1 %v821_v37  ;;  %s633_s5 = sshll.u32 %s918_s4, 4  ;;  %s634_s5 = int_to_ptr.vmem [resolvable:$true] %s633_s5 }
  0x44   :  { %714 = vmatprep.subr.bf16.mxu1 %v822_v48  ;;  %p887_p3 = scmp.lt.s32.totalorder %s634_s5, %s634_s5 }
  0x45   :  { %289 = vmatpush1.bf16.msra.mxu0 %v785_v23  ;;  %v693_v23 = vld [vmem:[%s1045_s6] ss:$0 sm:$0xff]  ;;  %s882_s6 = scalar_lea.vmem %s634_s5, 32 }
  0x46   :  { %290 = vmatprep.subr.bf16.mxu0 %v786_v24  ;;  %p883_p2 = scmp.ne.s32.totalorder %s634_s5, %s882_s6  ;;  %p888_p4 = scmp.lt.s32.totalorder %s882_s6, %s882_s6 }
  0x47   :  { %715 = vmatpush3.bf16.msra.mxu1 %v823_v49 }
  0x48   :  { %716 = vmatprep.subr.bf16.mxu1 %v824_v50  ;;  %p889_p5 = por %p888_p4, %p887_p3 }
  0x49   :  { %291 = vmatpush1.bf16.msra.mxu0 %v788_v27 }
  0x4a   :  { %292 = vmatprep.subr.bf16.mxu0 %v789_v28  ;;  %p890_p6 = pnand %p889_p5, %p883_p2 }
  0x4b   :  { %717 = vmatpush3.bf16.msra.mxu1 %v825_v51 }
  0x4c   :  { %733 = vmatprep.subr.bf16.mxu1 %v916_v52 }
  0x4d   :  { %293 = vmatpush1.bf16.msra.mxu0 %v791_v29 }
  0x4e   :  { %294 = vmatprep.subr.bf16.mxu0 %v792_v31 }
  0x51   :  { %295 = vmatpush1.bf16.msra.mxu0 %v794_v35 }
  0x52   :  { %296 = vmatprep.subr.bf16.mxu0 %v795_v36 }
  0x55   :  { %297 = vmatpush1.bf16.msra.mxu0 %v797_v38 }
  0x56   :  { %298 = vmatprep.subr.bf16.mxu0 %v798_v39 }
  0x59   :  { %299 = vmatpush1.bf16.msra.mxu0 %v800_v40 }
  0x5a   :  { %300 = vmatprep.subr.bf16.mxu0 %v801_v41 }
  0x5d   :  { %301 = vmatpush1.bf16.msra.mxu0 %v803_v42 }
  0x5e   :  { %302 = vmatprep.subr.bf16.mxu0 %v804_v43 }
  0x61   :  { %303 = vmatpush1.bf16.msra.mxu0 %v806_v44 }
  0x62   :  { %304 = vmatprep.subr.bf16.mxu0 %v807_v45 }
  0x65   :  { %305 = vmatpush1.bf16.msra.mxu0 %v809_v46 }
  0x68   :  { %307 = vmatmul.mubr.bf16.vlgmr.msra.gmra.mrb[0].mxu0 %v68_v47 }
 0x13b   :  { %v308_v60 = vpop.f32.mrb[0].mxu0 }
 0x13c   :  { %v309_v61 = vadd.f32 %v308_v60, %v107_v58  ;;  %v310_v62 = vpop.f32.mrb[1].mxu0 }
 0x13d   :  { %v311_v63 = vadd.f32 %v310_v62, %v111_v59  ;;  %v312_v0 = vpop.f32.mrb[2].mxu0 }
 0x13e   :  { %v315_v1 = vmax.f32 %v309_v61, 0.0  ;;  %v313_v2 = vpop.f32.mrb[3].mxu0 }
 0x13f   :  { %v316_v3 = vmax.f32 %v311_v63, 0.0 }
 0x140   :  { %v317_v6 = vpack.c.bf16 %v315_v1, %v315_v1 }
 0x141   :  { %v318_v4 = vpack.c.bf16 %v316_v3, %v316_v3 }
 0x143   :  { %486 = vmatprep.mubr.bf16.mxu1 %v318_v4 }
 0x144   :  { %487 = vmatmul.mubr.bf16.vlgmr.msra.gmra.mrb[0].mxu1 %v317_v6 }
 0x145   :  { %734 = vmatpush3.bf16.msra.mxu1 %v826_v5  ;;  %749 = vmatprep.mubr.msk.bf16.mxu1 %vm917_vm0, %v916_v52 }
 0x146   :  { %735 = vmatprep.subr.bf16.mxu1 %v916_v52 }
 0x149   :  { %736 = vmatpush3.bf16.msra.mxu1 %v827_v7 }
 0x14a   :  { %737 = vmatprep.subr.bf16.mxu1 %v916_v52 }
 0x14d   :  { %738 = vmatpush3.bf16.msra.mxu1 %v828_v8 }
 0x14e   :  { %739 = vmatprep.subr.bf16.mxu1 %v916_v52 }
 0x151   :  { %740 = vmatpush3.bf16.msra.mxu1 %v829_v9 }
 0x152   :  { %741 = vmatprep.subr.bf16.mxu1 %v916_v52 }
 0x155   :  { %742 = vmatpush3.bf16.msra.mxu1 %v830_v10 }
 0x156   :  { %743 = vmatprep.subr.bf16.mxu1 %v916_v52 }
 0x159   :  { %744 = vmatpush3.bf16.msra.mxu1 %v831_v11 }
 0x15a   :  { %745 = vmatprep.subr.bf16.mxu1 %v916_v52 }
 0x15d   :  { %746 = vmatpush3.bf16.msra.mxu1 %v832_v12 }
 0x15e   :  { %747 = vmatprep.subr.bf16.mxu1 %v916_v52 }
 0x161   :  { %748 = vmatpush3.bf16.msra.mxu1 %v833_v13 }
 0x217   :  { %v718_v14 = vpop.f32.mrb[0].mxu1 }
 0x218   :  { %v719_v16 = vpop.f32.mrb[1].mxu1 }
 0x219   :  { %v720_v17 = vadd.f32 %v719_v16, %v718_v14  ;;  %v721_v18 = vpop.f32.mrb[2].mxu1 }
 0x21a   :  { %v722_v19 = vpop.f32.mrb[3].mxu1 }
 0x21b   :  { %v489_v20 = vadd.f32 %v720_v17, %v676_v15 }
 0x21d   :  { %v494_v21 = vmax.f32 %v489_v20, 0.0 }
 0x21f   :  { %v495_v22 = vpack.c.bf16 %v494_v21, %v494_v21 }
 0x221   :  { %750 = vmatmul.mubr.bf16.vlgmr.msra.gmra.mrb[4].mxu1 %v495_v22 }
 0x2f4   :  { %v601_v24 = vpop.f32.mrb[4].mxu1 }
 0x2f5   :  { %v602_v25 = vadd.f32 %v693_v23, %v601_v24  ;;  %v751_v26 = vpop.f32.mrb[5].mxu1 }
 0x2f6   :  { %v604_v27 = vpop.f32.mrb[6].mxu1 }
 0x2f7   :  { %v607_v28 = vmax.f32 %v602_v25, 0.0  ;;  %v752_v29 = vpop.f32.mrb[7].mxu1 }
 0x2f9   :  { %v609_v30 = vsel %vm608_vm1, %v607_v28, -inf }
 0x2fa   :  { %610 = vmax.xlane.f32.xlu0 %v609_v30 }
 0x387   :  { %v611_v31 = vpop.xlane.xlu0 %610 }
 0x388   :  { %v612_v32 = vsub.f32 %v607_v28, %v611_v31 }
 0x38a   :  { %v613_v33 = vmul.f32 1.442695, %v612_v32 }
 0x38c   :  { %834 = vpow2.f32 %v613_v33 }
 0x396   :  { %v835_v35 = vpop.eup %834 }
 0x397   :  { %v620_v36 = vsel %vm617_vm2, %v835_v35, 0.0 }
 0x398   :  { %v621_v37 = vsel %vm608_vm1, %v620_v36, 0.0 }
 0x399   :  { %622 = vadd.xlane.f32.xlu0 %v621_v37 }
 0x426   :  { %v623_v38 = vpop.xlane.xlu0 %622 }
 0x427   :  { %836 = vrcp.f32 %v623_v38 }
 0x431   :  { %v837_v39 = vpop.eup %836 }
 0x432   :  { %v625_v40 = vmul.f32 %v837_v39, %v620_v36 }
 0x434   :  { %626 = vst [vmem:[#allocation7] sm:$0x3] %v625_v40 }
 0x435   :  { %893 = shalt.err (!%p890_p6)
}
 0x436   :  { %s894_s27 = scalar_lea.hbm %s1046_s7, 32 }
 0x437   :  { %p895_p7 = scmp.ne.s32.totalorder %s1046_s7, %s894_s27  ;;  %p898_p8 = scmp.lt.u32.totalorder %s894_s27, %s1046_s7 }
 0x439   :  { %p900_p9 = pnand %p898_p8, %p895_p7 }
 0x43b   :  { %903 = shalt.err (!%p900_p9)
}
 0x43c   :  { %636 = dma.vmem_to_hbm [thread:$0]  %s634_s5, 32, %s1046_s7, [#allocation4]  }
 0x43d   :  { %908 = dma.done.wait [#allocation4], 32  }
 0x43e   :  { %909 = vsyncadd [#allocation4], 4294967264 }
 0x43f   :  { %640 = vsyncpa [#allocation3], 1 }
 0x440   :  { %641 = vsyncpa [#allocation6], 1 }
 0x441   :  { %642 = vsyncpa [#allocation4], 1 }

</bundles_post_ra>
